<compile_context>
chip_gen: v7x
topology: tpu7x:2x2x1
jax: 0.10.0
libtpu: 0.0.40
codegen_flags: <defaults>
</compile_context>

<pallas_src>
import jax
import jax.numpy as jnp
from jax.experimental import pallas as pl
from jax.experimental.pallas import tpu as pltpu


def _make_conv3x3_elu_kernel(tile_h, width, cout, cin_tile, compute_dtype,
                             use_acc_scratch):
    th, w = tile_h, width

    def kernel(x_ref, halo_ref, w_ref, b_ref, o_ref, *scratch):
        k = pl.program_id(2)
        n_k = pl.num_programs(2)
        acc_ref = scratch[0] if use_acc_scratch else None

        @pl.when(k == 0)
        def _init():
            if use_acc_scratch:
                acc_ref[...] = jnp.zeros_like(acc_ref)
            else:
                o_ref[...] = jnp.zeros_like(o_ref)

        x = x_ref[0].astype(compute_dtype)            # (cin_t, TH, W)
        hal = halo_ref[0].astype(compute_dtype)       # (cin_t, 2, W)
        top = hal[:, 0:1, :]
        bot = hal[:, 1:2, :]

        # Row window: local row t <-> padded row (r*TH + t); the halo rows
        # already carry the image top/bottom reflection.
        xr = jnp.concatenate([top, x, bot], axis=1)   # (cin_t, TH+2, W)

        # Column taps with in-kernel reflection at the left/right borders:
        #   lft[..., w] = x[..., w-1]  (col -1 -> col 1)   used by kw = 0
        #   rgt[..., w] = x[..., w+1]  (col  W -> col W-2) used by kw = 2
        lft = jnp.concatenate([xr[:, :, 1:2], xr[:, :, :w - 1]], axis=2)
        rgt = jnp.concatenate([xr[:, :, 1:], xr[:, :, w - 2:w - 1]], axis=2)
        # Stack the three column taps along channels: row = kw*cin_tile + c.
        xs = jnp.concatenate([lft, xr, rgt], axis=0)  # (3*cin_t, TH+2, W)

        wk = w_ref[0]                                 # (3, Cout, 3*cin_t)

        # Three row-grouped accumulating matmuls (one per kernel row kh),
        # each with contraction K = 3*cin_tile; f32 accumulation on the MXU.
        part = jnp.zeros((cout, th * w), jnp.float32)
        for kh in range(3):
            op = xs[:, kh:kh + th, :].reshape(3 * cin_tile, th * w)
            part += jnp.dot(wk[kh], op, preferred_element_type=jnp.float32)

        if use_acc_scratch:
            acc_ref[...] += part
        else:
            o_ref[0] = o_ref[0] + part.astype(o_ref.dtype)

        @pl.when(k == n_k - 1)
        def _finalize():
            y = acc_ref[...] if use_acc_scratch else o_ref[0].astype(jnp.float32)
            y = y + b_ref[...]
            # ELU(alpha=1): y if y > 0 else exp(y) - 1 (exp arg clamped <= 0).
            o_ref[0] = jnp.where(
                y > 0, y, jnp.exp(jnp.minimum(y, 0.0)) - 1.0).astype(o_ref.dtype)

    return kernel


def _largest_divisor_leq(n, cap):
    best = 1
    for d in range(1, min(n, cap) + 1):
        if n % d == 0:
            best = d
    return best


def _pick_row_tile(h, w, cin_tile, cout, budget_bytes=24 * 1024 * 1024):
    """Largest row tile TH (multiple of 8 dividing H, TH*W % 128 == 0) whose
    per-step VMEM estimate fits the budget; falls back to TH = H."""
    lanes = 128
    padded_w = -(-w // lanes) * lanes

    def step_bytes(th):
        x_blk = cin_tile * th * padded_w * 4          # f32 activation block
        halo_blk = cin_tile * 8 * padded_w * 4        # halo block (sublane-padded)
        out_blk = cout * max(th * w, lanes) * 4       # f32 output block
        w_blk = 3 * cout * 3 * cin_tile * 2           # bf16 weight slab
        # 2x double-buffering of pipelined blocks + in-kernel bf16 temporaries.
        return 2 * (x_blk + halo_blk + out_blk + w_blk) + 2 * x_blk

    cands = [th for th in range(8, h, 8)
             if h % th == 0 and (th * w) % lanes == 0] + [h]
    fitting = [th for th in cands if step_bytes(th) <= budget_bytes]
    return max(fitting) if fitting else min(cands)


def conv_block_forward(x_nchw, weight, bias, *, cin_tile=None, row_tile=None,
                       compute_dtype=jnp.bfloat16):
    """ConvBlock forward: ReflectionPad2d(1) -> Conv2d(3x3) -> ELU.

    x_nchw : (N, Cin, H, W)
    weight : (Cout, Cin, 3, 3)  (PyTorch conv weight layout)
    bias   : (Cout,)
    returns: (N, Cout, H, W)
    """
    N, Cin, H, W = x_nchw.shape
    Cout = weight.shape[0]
    assert weight.shape == (Cout, Cin, 3, 3)
    assert H >= 2 and W >= 2, "ReflectionPad2d(1) needs H, W >= 2"

    if cin_tile is None:
        cin_tile = _largest_divisor_leq(Cin, 256)
    assert Cin % cin_tile == 0, f"cin_tile={cin_tile} must divide Cin={Cin}"
    n_k = Cin // cin_tile

    if row_tile is None:
        row_tile = _pick_row_tile(H, W, cin_tile, Cout)
    TH = int(row_tile)
    assert H % TH == 0, f"row_tile={TH} must divide H={H}"
    assert TH % 8 == 0 or TH == H, "row_tile must be a multiple of 8 (or H)"
    assert (TH * W) % 128 == 0 or TH == H, \
        "row_tile*W must be a multiple of 128 (or use row_tile=H)"
    n_r = H // TH

    # Halo rows (reflection applied at image top/bottom), gathered once so the
    # kernel's padded row window is a plain concat of [top, main, bot].
    top_idx = [1 if r == 0 else r * TH - 1 for r in range(n_r)]
    bot_idx = [H - 2 if r == n_r - 1 else (r + 1) * TH for r in range(n_r)]
    top = jnp.take(x_nchw, jnp.asarray(top_idx, dtype=jnp.int32), axis=2)
    bot = jnp.take(x_nchw, jnp.asarray(bot_idx, dtype=jnp.int32), axis=2)
    halo = jnp.stack([top, bot], axis=3)              # (N, Cin, n_r, 2, W)
    halo = jnp.transpose(halo, (0, 2, 1, 3, 4)).reshape(N * n_r, Cin, 2, W)

    # weight (Cout, Cin, 3, 3) -> (n_k, 3, Cout, 3*cin_tile); col = kw*cin_tile + c.
    wt = weight.astype(compute_dtype).reshape(Cout, n_k, cin_tile, 3, 3)
    wt = jnp.transpose(wt, (1, 3, 0, 4, 2))           # (k, kh, Cout, kw, c)
    w_r = wt.reshape(n_k, 3, Cout, 3 * cin_tile)
    b_r = bias.astype(jnp.float32).reshape(Cout, 1)

    out_dtype = x_nchw.dtype
    use_acc_scratch = jnp.dtype(out_dtype) != jnp.dtype(jnp.float32)
    scratch_shapes = ([pltpu.VMEM((Cout, TH * W), jnp.float32)]
                      if use_acc_scratch else [])

    cost = pl.CostEstimate(
        flops=2 * N * Cout * 9 * Cin * H * W,
        transcendentals=N * Cout * H * W,
        bytes_accessed=(x_nchw.size + halo.size + b_r.size
                        + N * Cout * H * W) * 4 + w_r.size * 2,
    )

    kernel = _make_conv3x3_elu_kernel(TH, W, Cout, cin_tile, compute_dtype,
                                      use_acc_scratch)

    out_flat = pl.pallas_call(
        kernel,
        out_shape=jax.ShapeDtypeStruct((N, Cout, H * W), out_dtype),
        grid_spec=pltpu.PrefetchScalarGridSpec(
            num_scalar_prefetch=0,
            grid=(N, n_r, n_k),
            in_specs=[
                # Activation row tile (unpadded NCHW slab).
                pl.BlockSpec((1, cin_tile, TH, W),
                             lambda n, r, k: (n, k, r, 0)),
                # Two halo rows for this (image, row tile), same cin slab.
                pl.BlockSpec((1, cin_tile, 2, W),
                             lambda n, r, k: (n * n_r + r, k, 0, 0)),
                # Per-step weight slab for the current cin tile only.
                pl.BlockSpec((1, 3, Cout, 3 * cin_tile),
                             lambda n, r, k: (k, 0, 0, 0)),
                # Bias: tiny, grid-invariant.
                pl.BlockSpec((Cout, 1), lambda n, r, k: (0, 0)),
            ],
            # Output block index is independent of k -> resident accumulator
            # across the Cin reduction; last dim TH*W is lane-dense.
            out_specs=pl.BlockSpec((1, Cout, TH * W),
                                   lambda n, r, k: (n, 0, r)),
            scratch_shapes=scratch_shapes,
        ),
        compiler_params=pltpu.CompilerParams(
            dimension_semantics=("parallel", "parallel", "arbitrary"),
            vmem_limit_bytes=48 * 1024 * 1024),
        cost_estimate=cost,
    )(x_nchw, halo, w_r, b_r)

    # (N, Cout, H*W) -> (N, Cout, H, W): contiguous reshape, no data movement.
    return out_flat.reshape(N, Cout, H, W)


def _reference(x_nchw, weight, bias, compute_dtype=jnp.float32):
    """Pure-JAX reference of the PyTorch ConvBlock forward.  With
    compute_dtype=bfloat16 it applies the same operand rounding the kernel's
    MXU inputs see (f32 accumulation either way)."""
    xc = x_nchw.astype(compute_dtype).astype(jnp.float32)
    wc = weight.astype(compute_dtype).astype(jnp.float32)
    x_pad = jnp.pad(xc, ((0, 0), (0, 0), (1, 1), (1, 1)), mode="reflect")
    out = jax.lax.conv_general_dilated(
        x_pad, wc, window_strides=(1, 1), padding="VALID",
        dimension_numbers=("NCHW", "OIHW", "NCHW"),
        precision=jax.lax.Precision.HIGHEST)
    out = out + bias.reshape(1, -1, 1, 1).astype(jnp.float32)
    return jnp.where(out > 0, out, jnp.exp(jnp.minimum(out, 0.0)) - 1.0)


if __name__ == "__main__":
    # Small deterministic example: N=2, Cin=4, Cout=8, H=W=16.
    N, Cin, Cout, H, W = 2, 4, 8, 16, 16
    key = jax.random.PRNGKey(0)
    kx, kw, kb = jax.random.split(key, 3)

    x = jax.random.normal(kx, (N, Cin, H, W), dtype=jnp.float32)
    # Deterministic params (shapes from nn.Conv2d(Cin, Cout, 3)).
    fan_in = Cin * 3 * 3
    bound = 1.0 / float(fan_in) ** 0.5
    weight = jax.random.uniform(kw, (Cout, Cin, 3, 3),
                                minval=-bound, maxval=bound, dtype=jnp.float32)
    bias = jax.random.uniform(kb, (Cout,), minval=-bound, maxval=bound,
                              dtype=jnp.float32)

    # cin_tile=2 exercises the Cin-reduction axis; row_tile=8 exercises the
    # row-tiled grid with the top/bottom reflection halos.
    out = conv_block_forward(x, weight, bias, cin_tile=2, row_tile=8)
    jax.block_until_ready(out)

    # Compare against a reference with the same bf16 operand rounding as the
    # kernel's MXU inputs (remaining difference is f32 summation order only).
    ref = _reference(x, weight, bias, compute_dtype=jnp.bfloat16)
    assert out.shape == (N, Cout, H, W)
    assert jnp.allclose(out, ref, atol=1e-4, rtol=1e-4), (
        float(jnp.max(jnp.abs(out - ref))))

    print("KERNEL_OK")
</pallas_src>

<mosaic_0001>
module attributes {stable_mosaic.version = 11 : i64} {
  func.func @kernel(%arg0: i32, %arg1: i32, %arg2: i32, %arg3: memref<1x2x8x16xf32, #tpu.memory_space<vmem>>, %arg4: memref<1x2x2x16xf32, #tpu.memory_space<vmem>>, %arg5: memref<1x3x8x6xbf16, #tpu.memory_space<vmem>>, %arg6: memref<8x1xf32, #tpu.memory_space<vmem>>, %arg7: memref<1x8x128xf32, #tpu.memory_space<vmem>>) attributes {dimension_semantics = [#tpu.dimension_semantics<parallel>, #tpu.dimension_semantics<parallel>, #tpu.dimension_semantics<arbitrary>], iteration_bounds = array<i64: 2, 2, 2>, scalar_prefetch = 0 : i64, scratch_operands = 0 : i64, tpu.core_type = #tpu.core_type<tc>, window_params = [{transform_indices = @transform_0, window_bounds = array<i64: 1, 2, 8, 16>}, {transform_indices = @transform_1, window_bounds = array<i64: 1, 2, 2, 16>}, {transform_indices = @transform_2, window_bounds = array<i64: 1, 3, 8, 6>}, {pipeline_mode = #tpu.pipeline_mode<synchronous>, transform_indices = @transform_3, window_bounds = array<i64: 8, 1>}, {transform_indices = @transform_4, window_bounds = array<i64: 1, 8, 128>}]} {
    %c0_i32 = arith.constant 0 : i32
    %0 = arith.cmpi eq, %arg2, %c0_i32 : i32
    %1 = arith.extui %0 : i1 to i32
    %c0_i32_0 = arith.constant 0 : i32
    %2 = arith.cmpi ne, %1, %c0_i32_0 : i32
    scf.if %2 {
      %cst_22 = arith.constant 0.000000e+00 : f32
      %49 = vector.broadcast %cst_22 : f32 to vector<1x8x128xf32>
      %c0_23 = arith.constant 0 : index
      %c0_24 = arith.constant 0 : index
      %c0_25 = arith.constant 0 : index
      %50 = vector.load %arg7[%c0_23, %c0_24, %c0_25] : memref<1x8x128xf32, #tpu.memory_space<vmem>>, vector<1x8x128xf32>
      tpu.vector_store %arg7[%c0_23, %c0_24, %c0_25], %49 {strides = array<i32>} : memref<1x8x128xf32, #tpu.memory_space<vmem>>, vector<1x8x128xf32>,
    } else {
    }
    %c0 = arith.constant 0 : index
    %c0_1 = arith.constant 0 : index
    %c0_2 = arith.constant 0 : index
    %c0_3 = arith.constant 0 : index
    %3 = vector.load %arg3[%c0, %c0_1, %c0_2, %c0_3] : memref<1x2x8x16xf32, #tpu.memory_space<vmem>>, vector<1x2x8x16xf32>
    %4 = vector.shape_cast %3 : vector<1x2x8x16xf32> to vector<2x8x16xf32>
    %5 = arith.truncf %4 : vector<2x8x16xf32> to vector<2x8x16xbf16>
    %c0_4 = arith.constant 0 : index
    %c0_5 = arith.constant 0 : index
    %c0_6 = arith.constant 0 : index
    %c0_7 = arith.constant 0 : index
    %6 = vector.load %arg4[%c0_4, %c0_5, %c0_6, %c0_7] : memref<1x2x2x16xf32, #tpu.memory_space<vmem>>, vector<1x2x2x16xf32>
    %7 = vector.shape_cast %6 : vector<1x2x2x16xf32> to vector<2x2x16xf32>
    %8 = arith.truncf %7 : vector<2x2x16xf32> to vector<2x2x16xbf16>
    %9 = vector.extract_strided_slice %8 {offsets = [0, 0, 0], sizes = [2, 1, 16], strides = [1, 1, 1]} : vector<2x2x16xbf16> to vector<2x1x16xbf16>
    %10 = vector.extract_strided_slice %8 {offsets = [0, 1, 0], sizes = [2, 1, 16], strides = [1, 1, 1]} : vector<2x2x16xbf16> to vector<2x1x16xbf16>
    %11 = tpu.concatenate %9, %5, %10 in 1 : vector<2x1x16xbf16>, vector<2x8x16xbf16>, vector<2x1x16xbf16> -> vector<2x10x16xbf16>
    %12 = vector.extract_strided_slice %11 {offsets = [0, 0, 1], sizes = [2, 10, 1], strides = [1, 1, 1]} : vector<2x10x16xbf16> to vector<2x10x1xbf16>
    %13 = vector.extract_strided_slice %11 {offsets = [0, 0, 0], sizes = [2, 10, 15], strides = [1, 1, 1]} : vector<2x10x16xbf16> to vector<2x10x15xbf16>
    %14 = tpu.concatenate %12, %13 in 2 : vector<2x10x1xbf16>, vector<2x10x15xbf16> -> vector<2x10x16xbf16>
    %15 = vector.extract_strided_slice %11 {offsets = [0, 0, 1], sizes = [2, 10, 15], strides = [1, 1, 1]} : vector<2x10x16xbf16> to vector<2x10x15xbf16>
    %16 = vector.extract_strided_slice %11 {offsets = [0, 0, 14], sizes = [2, 10, 1], strides = [1, 1, 1]} : vector<2x10x16xbf16> to vector<2x10x1xbf16>
    %17 = tpu.concatenate %15, %16 in 2 : vector<2x10x15xbf16>, vector<2x10x1xbf16> -> vector<2x10x16xbf16>
    %18 = tpu.concatenate %14, %11, %17 in 0 : vector<2x10x16xbf16>, vector<2x10x16xbf16>, vector<2x10x16xbf16> -> vector<6x10x16xbf16>
    %c0_8 = arith.constant 0 : index
    %c0_9 = arith.constant 0 : index
    %c0_10 = arith.constant 0 : index
    %c0_11 = arith.constant 0 : index
    %19 = vector.load %arg5[%c0_8, %c0_9, %c0_10, %c0_11] : memref<1x3x8x6xbf16, #tpu.memory_space<vmem>>, vector<1x3x8x6xbf16>
    %20 = vector.shape_cast %19 : vector<1x3x8x6xbf16> to vector<3x8x6xbf16>
    %cst = arith.constant 0.000000e+00 : f32
    %21 = vector.broadcast %cst : f32 to vector<8x128xf32>
    %22 = vector.extract_strided_slice %18 {offsets = [0, 0, 0], sizes = [6, 8, 16], strides = [1, 1, 1]} : vector<6x10x16xbf16> to vector<6x8x16xbf16>
    %23 = vector.shape_cast %22 : vector<6x8x16xbf16> to vector<6x128xbf16>
    %24 = vector.extract_strided_slice %20 {offsets = [0, 0, 0], sizes = [1, 8, 6], strides = [1, 1, 1]} : vector<3x8x6xbf16> to vector<1x8x6xbf16>
    %25 = vector.shape_cast %24 : vector<1x8x6xbf16> to vector<8x6xbf16>
    %cst_12 = arith.constant dense<0.000000e+00> : vector<8x128xf32>
    %26 = tpu.matmul %25, %23, %cst_12 {dimension_numbers = #tpu.dot_dimension_numbers<[1], [0], [0], [1], [0, 0, 1, 1], [], []>} : vector<8x6xbf16>, vector<6x128xbf16>, vector<8x128xf32> -> vector<8x128xf32>
    %27 = arith.addf %21, %26 : vector<8x128xf32>
    %28 = vector.extract_strided_slice %18 {offsets = [0, 1, 0], sizes = [6, 8, 16], strides = [1, 1, 1]} : vector<6x10x16xbf16> to vector<6x8x16xbf16>
    %29 = vector.shape_cast %28 : vector<6x8x16xbf16> to vector<6x128xbf16>
    %30 = vector.extract_strided_slice %20 {offsets = [1, 0, 0], sizes = [1, 8, 6], strides = [1, 1, 1]} : vector<3x8x6xbf16> to vector<1x8x6xbf16>
    %31 = vector.shape_cast %30 : vector<1x8x6xbf16> to vector<8x6xbf16>
    %cst_13 = arith.constant dense<0.000000e+00> : vector<8x128xf32>
    %32 = tpu.matmul %31, %29, %cst_13 {dimension_numbers = #tpu.dot_dimension_numbers<[1], [0], [0], [1], [0, 0, 1, 1], [], []>} : vector<8x6xbf16>, vector<6x128xbf16>, vector<8x128xf32> -> vector<8x128xf32>
    %33 = arith.addf %27, %32 : vector<8x128xf32>
    %34 = vector.extract_strided_slice %18 {offsets = [0, 2, 0], sizes = [6, 8, 16], strides = [1, 1, 1]} : vector<6x10x16xbf16> to vector<6x8x16xbf16>
    %35 = vector.shape_cast %34 : vector<6x8x16xbf16> to vector<6x128xbf16>
    %36 = vector.extract_strided_slice %20 {offsets = [2, 0, 0], sizes = [1, 8, 6], strides = [1, 1, 1]} : vector<3x8x6xbf16> to vector<1x8x6xbf16>
    %37 = vector.shape_cast %36 : vector<1x8x6xbf16> to vector<8x6xbf16>
    %cst_14 = arith.constant dense<0.000000e+00> : vector<8x128xf32>
    %38 = tpu.matmul %37, %35, %cst_14 {dimension_numbers = #tpu.dot_dimension_numbers<[1], [0], [0], [1], [0, 0, 1, 1], [], []>} : vector<8x6xbf16>, vector<6x128xbf16>, vector<8x128xf32> -> vector<8x128xf32>
    %39 = arith.addf %33, %38 : vector<8x128xf32>
    %c0_15 = arith.constant 0 : index
    %c0_16 = arith.constant 0 : index
    %c0_17 = arith.constant 0 : index
    %40 = vector.load %arg7[%c0_15, %c0_16, %c0_17] : memref<1x8x128xf32, #tpu.memory_space<vmem>>, vector<1x8x128xf32>
    %41 = vector.shape_cast %40 : vector<1x8x128xf32> to vector<8x128xf32>
    %42 = arith.addf %41, %39 : vector<8x128xf32>
    %c0_18 = arith.constant 0 : index
    %c0_19 = arith.constant 0 : index
    %c0_20 = arith.constant 0 : index
    %43 = vector.load %arg7[%c0_18, %c0_19, %c0_20] : memref<1x8x128xf32, #tpu.memory_space<vmem>>, vector<1x8x128xf32>
    %44 = vector.shape_cast %43 : vector<1x8x128xf32> to vector<8x128xf32>
    %45 = vector.shape_cast %42 : vector<8x128xf32> to vector<1x8x128xf32>
    tpu.vector_store %arg7[%c0_18, %c0_19, %c0_20], %45 {strides = array<i32>} : memref<1x8x128xf32, #tpu.memory_space<vmem>>, vector<1x8x128xf32>,
    %c1_i32 = arith.constant 1 : i32
    %46 = arith.cmpi eq, %arg2, %c1_i32 : i32
    %47 = arith.extui %46 : i1 to i32
    %c0_i32_21 = arith.constant 0 : i32
    %48 = arith.cmpi ne, %47, %c0_i32_21 : i32
    scf.if %48 {
      %c0_22 = arith.constant 0 : index
      %c0_23 = arith.constant 0 : index
      %c0_24 = arith.constant 0 : index
      %49 = vector.load %arg7[%c0_22, %c0_23, %c0_24] : memref<1x8x128xf32, #tpu.memory_space<vmem>>, vector<1x8x128xf32>
      %50 = vector.shape_cast %49 : vector<1x8x128xf32> to vector<8x128xf32>
      %c0_25 = arith.constant 0 : index
      %c0_26 = arith.constant 0 : index
      %51 = vector.load %arg6[%c0_25, %c0_26] : memref<8x1xf32, #tpu.memory_space<vmem>>, vector<8x1xf32>
      %52 = vector.broadcast %51 : vector<8x1xf32> to vector<8x128xf32>
      %53 = arith.addf %50, %52 : vector<8x128xf32>
      %cst_27 = arith.constant 0.000000e+00 : f32
      %54 = vector.broadcast %cst_27 : f32 to vector<8x128xf32>
      %55 = arith.cmpf ogt, %53, %54 : vector<8x128xf32>
      %cst_28 = arith.constant 0.000000e+00 : f32
      %56 = vector.broadcast %cst_28 : f32 to vector<8x128xf32>
      %57 = arith.minimumf %53, %56 : vector<8x128xf32>
      %58 = math.exp %57 : vector<8x128xf32>
      %cst_29 = arith.constant 1.000000e+00 : f32
      %59 = vector.broadcast %cst_29 : f32 to vector<8x128xf32>
      %60 = arith.subf %58, %59 : vector<8x128xf32>
      %61 = arith.select %55, %53, %60 : vector<8x128xi1>, vector<8x128xf32>
      %c0_30 = arith.constant 0 : index
      %c0_31 = arith.constant 0 : index
      %c0_32 = arith.constant 0 : index
      %62 = vector.load %arg7[%c0_30, %c0_31, %c0_32] : memref<1x8x128xf32, #tpu.memory_space<vmem>>, vector<1x8x128xf32>
      %63 = vector.shape_cast %62 : vector<1x8x128xf32> to vector<8x128xf32>
      %64 = vector.shape_cast %61 : vector<8x128xf32> to vector<1x8x128xf32>
      tpu.vector_store %arg7[%c0_30, %c0_31, %c0_32], %64 {strides = array<i32>} : memref<1x8x128xf32, #tpu.memory_space<vmem>>, vector<1x8x128xf32>,
    } else {
    }
    return
  }
  func.func @transform_0(%arg0: i32, %arg1: i32, %arg2: i32) -> (i32, i32, i32, i32) {
    %c0_i32 = arith.constant 0 : i32
    %c0_i32_0 = arith.constant 0 : i32
    return %arg0, %arg2, %arg1, %c0_i32 : i32, i32, i32, i32
  }
  func.func @transform_1(%arg0: i32, %arg1: i32, %arg2: i32) -> (i32, i32, i32, i32) {
    %c2_i32 = arith.constant 2 : i32
    %0 = arith.muli %arg0, %c2_i32 : i32
    %1 = arith.addi %0, %arg1 : i32
    %c0_i32 = arith.constant 0 : i32
    %c0_i32_0 = arith.constant 0 : i32
    %c0_i32_1 = arith.constant 0 : i32
    return %1, %arg2, %c0_i32, %c0_i32_0 : i32, i32, i32, i32
  }
  func.func @transform_2(%arg0: i32, %arg1: i32, %arg2: i32) -> (i32, i32, i32, i32) {
    %c0_i32 = arith.constant 0 : i32
    %c0_i32_0 = arith.constant 0 : i32
    %c0_i32_1 = arith.constant 0 : i32
    %c0_i32_2 = arith.constant 0 : i32
    return %arg2, %c0_i32, %c0_i32_0, %c0_i32_1 : i32, i32, i32, i32
  }
  func.func @transform_3(%arg0: i32, %arg1: i32, %arg2: i32) -> (i32, i32) {
    %c0_i32 = arith.constant 0 : i32
    %c0_i32_0 = arith.constant 0 : i32
    %c0_i32_1 = arith.constant 0 : i32
    return %c0_i32, %c0_i32_0 : i32, i32
  }
  func.func @transform_4(%arg0: i32, %arg1: i32, %arg2: i32) -> (i32, i32, i32) {
    %c0_i32 = arith.constant 0 : i32
    %c0_i32_0 = arith.constant 0 : i32
    return %arg0, %c0_i32, %arg1 : i32, i32, i32
  }
}

</mosaic_0001>

<bundles_post_ra>
// kernel: tpu_custom_call.1
= control target key start
LH: loop header
LB: loop body
LE: loop exit
PB: predicated region body
PF: predicated region fallthrough
CT: control target
= control target key end

     0   :  { %s1974_s0 = inlined_call_operand.hbm [shape: f32[2,4,16,16], index: 0, kind: input, shape index: {}]   ;;  %s1975_s1 = inlined_call_operand.vmem [shape: f32[4,4,2,16], index: 1, kind: input, shape index: {}]   ;;  %s1976_s2 = inlined_call_operand.vmem [shape: bf16[2,3,8,6], index: 2, kind: input, shape index: {}]   ;;  %s1977_s3 = inlined_call_operand.vmem [shape: f32[8,1], index: 3, kind: input, shape index: {}]   ;;  %s1978_s4 = inlined_call_operand.hbm [shape: f32[2,8,256], index: 4, kind: output, shape index: {}]  }
   0x1   :  { %1990 = sst [smem:[#allocation15_spill]] %s1978_s4 }
   0x2   :  { %9 = vsyncpa [#allocation3], 0 }
   0x3   :  { %11 = vsyncpa [#allocation3 + $0x1], 0 }
   0x4   :  { %12 = vsyncpa [#allocation4], 0 }
   0x5   :  { %14 = vsyncpa [#allocation4 + $0x1], 0  ;;  %s1524_s15 = smov 0   ;;  %s1526_s16 = smov 0  }
   0x6   :  { %s1528_s17 = smov 0   ;;  %s1530_s18 = smov 0  }
   0x7   :  { %s1532_s19 = smov 0   ;;  %s1534_s20 = smov 0  }
   0x8   :  { %s1536_s21 = smov 0   ;;  %s1538_s22 = smov 0  }
   0x9   :  { %s1540_s23 = smov 0   ;;  %s1542_s24 = smov 0  }
   0xa   :  { %s1544_s25 = smov 0   ;;  %s1546_s26 = smov 0  }
   0xb   :  { %s1548_s27 = smov 0  }
   0xc LB: > { %1991 = sst [smem:[#allocation8_spill]] %s1428_s15  ;;  %s1112_s28 = sadd.s32 4294967295, %s1476_s27   ;;  %s1476_s27 = sphi %s1548_s27, %s20_s27   ;;  %s1472_s26 = sphi %s1546_s26, %s2026_s26   ;;  %s1468_s25 = sphi %s1544_s25, %s2025_s25   ;;  %s1464_s24 = sphi %s1542_s24, %s2014_s24   ;;  %s1460_s23 = sphi %s1540_s23, %s2024_s23   ;;  %s1456_s22 = sphi %s1538_s22, %s2023_s22   ;;  %s1452_s21 = sphi %s1536_s21, %s2013_s21   ;;  %s1448_s20 = sphi %s1534_s20, %s2022_s20   ;;  %s1444_s19 = sphi %s1532_s19, %s2021_s19   ;;  %s1440_s18 = sphi %s1530_s18, %s2020_s18   ;;  %s1436_s17 = sphi %s1528_s17, %s2019_s17   ;;  %s1432_s16 = sphi %s1526_s16, %s2018_s16   ;;  %s1428_s15 = sphi %s1524_s15, %s2017_s15  }
   0xd   : > { %1992 = sst [smem:[#allocation9_spill]] %s1464_s24  ;;  %s1113_s29 = sadd.s32 4294967294, %s1476_s27  }
   0xe   : > { %s32_s30 = sadd.s32 1, %s1464_s24  ;;  %s35_s5 = sadd.s32 1, %s1468_s25 }
   0xf   : > { %p33_p0 = scmp.ge.s32.totalorder %s32_s30, 2  ;;  %s39_s6 = sadd.s32 1, %s1472_s26 }
  0x10   : > { %p57_p1 = scmp.ne.s32.totalorder %s1448_s20, %s1444_s19  ;;  %p58_p2 = scmp.eq.s32.totalorder %s1476_s27, 0 }
  0x11   : > { %s2028_s30 = smov (%p33_p0, %s32_s30), 0  ;;  %s2030_s5 = smov (!%p33_p0, %s35_s5), %s1468_s25 }
  0x12   : > { %1993 = sst [smem:[#allocation10_spill]] %s2028_s30  ;;  %s44_s8 = ssub.s32 %s1464_s24, %s2028_s30 }
  0x13   : > { %p37_p3 = scmp.ge.s32.totalorder %s2030_s5, 2  ;;  %p63_p4 = scmp.ne.s32.totalorder %s1444_s19, %s1440_s18 }
  0x14   : > { %p1605_p5 = por %p58_p2, %p57_p1  ;;  %p64_p6 = scmp.eq.s32.totalorder %s1112_s28, 0 }
  0x15   : > { %s2032_s5 = smov (%p37_p3, %s2030_s5), 0  ;;  %s2034_s6 = smov (!%p37_p3, %s39_s6), %s1472_s26 }
  0x16   : > { %1995 = sst [smem:[#allocation11_spill]] %s2032_s5  ;;  %s46_s10 = ssub.s32 %s1468_s25, %s2032_s5 }
  0x17   : > { %p1614_p7 = por %p64_p6, %p63_p4  ;;  %p41_p8 = scmp.ge.s32.totalorder %s2034_s6, 2 }
  0x18   : > { %s157_s12 = sadd.s32 1, %s1436_s17  ;;  %p167_p9 = scmp.ne.s32.totalorder %s1436_s17, %s1432_s16 }
  0x19   : > { %p168_p10 = scmp.eq.s32.totalorder %s1112_s28, 7  ;;  %s2036_s6 = smov (%p41_p8, %s2034_s6), 0 }
  0x1a   : > { %1997 = sst [smem:[#allocation12_spill]] %s2036_s6  ;;  %p173_p12 = scmp.ne.s32.totalorder %s1432_s16, %s1428_s15 }
  0x1b   : > { %p1623_p11 = por %p168_p10, %p167_p9  ;;  %s43_s14 = ssub.s32 %s1472_s26, %s2036_s6 }
  0x1c   : > { %p174_p13 = scmp.eq.s32.totalorder %s1113_s29, 7  ;;  %s45_s18 = sor.u32 %s44_s8, %s43_s14 }
  0x1d   : > { %s1998_s13 = scalar_select %p1623_p11, 1, 0 }
  0x1e   : > { %s154_s7 = sor.u32 %s46_s10, %s43_s14  ;;  %s47_s5 = sor.u32 %s46_s10, %s45_s18 }
  0x1f   : > { %1999 = sst [smem:[#allocation13_spill]] %s1998_s13  ;;  %p155_p0 = scmp.eq.s32.totalorder %s154_s7, 0 }
  0x20   : > { %p48_p1 = scmp.eq.s32.totalorder %s47_s5, 0  ;;  %p1631_p2 = por %p174_p13, %p173_p12 }
  0x21   : > { %s1636_s30 = scalar_select %p155_p0, %s1436_s17, %s157_s12  }
  0x22   : > { %s2000_s28 = scalar_select %p1631_p2, 1, 0 }
  0x23   : > { %s2002_s4 = sadd.s32 1, %s1448_s20  ;;  %p1180_p3 = scmp.lt.s32.totalorder %s1476_s27, 8 }
  0x24   : > { %2001 = sst [smem:[#allocation14_spill]] %s2000_s28  ;;  %s197_s15 = sand.u32 1, %s1448_s20  }
  0x25   : > { %s1641_s13 = scalar_select %p48_p1, %s1448_s20, %s2002_s4  }
  0x26   : > { %s1142_s6 = sshll.u32 %s1464_s24, 2  ;;  %s1118_s29 = sshll.u32 %s197_s15, 4 }
  0x27   : > { %s207_s8 = sadd.s32 %s1468_s25, %s1142_s6  ;;  %s1121_s14 = sshll.u32 %s1472_s26, 3 }
  0x28   : > { %s201_s10 = scalar_lea.vmem [#allocation2], %s1118_s29  ;;  %s209_s18 = sadd.s32 %s1121_s14, %s207_s8 }
  0x29   : > { %s212_s7 = sshll.u32 %s201_s10, 4  ;;  %s1122_s5 = sshll.u32 %s209_s18, 7  ;;  %s1648_s7 = int_to_ptr.vmem [resolvable:$true] %s212_s7 }
  0x2a   : > { %p1652_p4 = pnand %p1180_p3, %p1605_p5  ;;  %s1659_s24 = scalar_lea.hbm %s1974_s0, %s1122_s5 }
  0x2b   : > { %s1662_s6 = scalar_lea.sflag [#allocation3], %s197_s15  ;;  %s1308_s29 = scalar_lea.hbm %s1659_s24, 256 }
  0x2c   : > { %p1309_p8 = scmp.ne.s32.totalorder %s1659_s24, %s1308_s29  ;;  %p1310_p5 = pneg %p1652_p4 }
  0x2d   : > { %s1313_s14 = scalar_lea.hbm %s1974_s0, 2048  ;;  %p1314_p12 = scmp.lt.u32.totalorder %s1659_s24, %s1974_s0 }
  0x2e   : > { %p1311_p9 = pnand %p1310_p5, %p1309_p8  ;;  %p1315_p13 = scmp.lt.u32.totalorder %s1313_s14, %s1308_s29 }
  0x2f   : > { %p1317_p1 = scmp.lt.u32.totalorder %s1308_s29, %s1659_s24 }
  0x30   : > { %p1312_p10 = pneg %p1311_p9  ;;  %p1316_p0 = por %p1315_p13, %p1314_p12 }
  0x32   : > { %p1318_p3 = por %p1317_p1, %p1316_p0 }
  0x34   : > { %p1319_p6 = pnand %p1318_p3, %p1312_p10 }
  0x36   : > { %1322 = shalt.err (!%p1319_p6)
}
  0x37   : > { %s1323_s15 = scalar_lea.vmem %s1648_s7, 256  ;;  %s1478_s5 = smov [#allocation2]  }
  0x38   : > { %p1324_p8 = scmp.ne.s32.totalorder %s1648_s7, %s1323_s15  ;;  %s1328_s12 = sshll.u32 %s1478_s5, 4  ;;  %s1329_s12 = int_to_ptr.vmem [resolvable:$false] %s1328_s12 }
  0x39   : > { %s1330_s4 = scalar_lea.vmem %s1329_s12, 512  ;;  %p1331_p11 = scmp.lt.s32.totalorder %s1648_s7, %s1329_s12 }
  0x3a   : > { %p1326_p9 = pnand %p1324_p8, %p1310_p5  ;;  %p1332_p12 = scmp.lt.s32.totalorder %s1330_s4, %s1323_s15 }
  0x3c   : > { %p1327_p2 = pneg %p1326_p9  ;;  %p1333_p13 = por %p1332_p12, %p1331_p11 }
  0x3e   : > { %p1334_p0 = pnand %p1333_p13, %p1327_p2 }
  0x40   : > { %1337 = shalt.err (!%p1334_p0)
}
  0x41   : > { %s1479_s29 = smov 256   ;;  %s1480_s9 = smov 128  }
  0x42   : > { %s1481_s8 = smov 8   ;;  %p245_p6 = scmp.lt.s32.totalorder %s1476_s27, 9 }
  0x43   : > { %1175 = dma.hbm_to_vmem [thread:$0]  (!%p1652_p4), %s1659_s24, 256, %s1648_s7, %s1662_s6, %s1479_s29, %s1480_s9, %s1481_s8  }
  0x44   : > { %p2004_p5 = scmp.ge.s32.totalorder %s1476_s27, 1 }
  0x46   : > { %p246_p10 = pnand %p2004_p5, %p245_p6 }
  0x47   : > { %s251_s14 = sand.u32 (!%p246_p10), 1, %s1444_s19  }
  0x48   : > { %249 = sbr.rel (%p246_p10) target bundleno = 670 (0x29e), region = 36  ;;  %s1694_s10 = sshll.u32 (!%p246_p10), %s251_s14, 4 }
  0x49   : > { %s252_s18 = scalar_lea.sflag (!%p246_p10), [#allocation3], %s251_s14  ;;  %s255_s15 = scalar_lea.vmem (!%p246_p10), [#allocation2], %s1694_s10 }
  0x4f   : > { %1419 = dma.done.wait (%p1614_p7), %s252_s18, 256  }
  0x50   : > { %1421 = vsyncadd (%p1614_p7), %s252_s18, 4294967040  ;;  %s1989_s24 = sand.u32 1, %s1432_s16   ;;  %s1126_s28 = sshll.u32 %s1460_s23, 1 }
  0x51   : > { %s1125_s7 = sshll.u32 %s1989_s24, 3  ;;  %s1706_s6 = sadd.s32 %s1456_s22, %s1126_s28 }
  0x52   : > { %s1127_s5 = sshll.u32 %s1452_s21, 1  ;;  %p300_p11 = scmp.lt.s32.totalorder %s1706_s6, 3 }
  0x53   : > { %p302_p2 = scmp.lt.s32.totalorder %s1127_s5, 3  ;;  %p311_p7 = scmp.lt.s32.totalorder %s1452_s21, 1 }
  0x54   : > { %s301_s11 = scalar_select %p300_p11, %s1706_s6, 3 }
  0x55   : > { %s2038_s5 = smov (!%p302_p2, %s1127_s5), 3  ;;  %s1721_s24 = scalar_lea.vmem [#allocation5], %s1125_s7 }
  0x56   : > { %s1128_s12 = sshll.u32 %s301_s11, 2  ;;  %p1131_p4 = scmp.ne.s32.totalorder %s1452_s21, 0 }
  0x57   : > { %s305_s4 = sadd.s32 %s1128_s12, %s2038_s5  ;;  %v1482_v0 = vmov (!%p1131_p4), 0.0  }
  0x58   : > { %s1129_s29 = sshll.u32 %s305_s4, 1  ;;  %320 = sbr.rel (%p1131_p4) target bundleno = 95 (0x5f), region = 44  ;;  %321 = vst [vmem:[%s1721_s24] sm:$0xff] (!%p1131_p4), %v1482_v0 }
  0x59   : > { %s307_s14 = scalar_lea.vmem %s1975_s1, %s1129_s29 }
  0x5a   : > { %s312_s23 = scalar_select %p311_p7, %s1452_s21, 1 }
  0x5c   : > { %s1167_s10 = smul.u32 12, %s312_s23 }
  0x5e   : > { %s1719_s28 = scalar_lea.vmem %s1976_s2, %s1167_s10 }
  0x5f PF: > { %v322_v1 = vld [vmem:[%s255_s15] sm:$0xff]  ;;  %v323_v4 = vld [vmem:[%s255_s15 + $0x8] sm:$0xff]  ;;  %vm352_vm0 = vcmask 1040384   ;;  %vm353_vm1 = vsmask.f32 256  ;;  %vm357_vm2 = vcmask 1044480   ;;  %v393_v25 = vlaneseq }
  0x60   : > { %v326_v2 = vld [vmem:[%s307_s14] sm:$0x3]  ;;  %v324_v3 = vpack.c.bf16 %v322_v1, %v322_v1  ;;  %v325_v6 = vpack.c.bf16 %v323_v4, %v323_v4  ;;  %v327_v7 = vld [vmem:[%s307_s14 + $0x2] sm:$0x3]  ;;  %vm358_vm3 = vsmask.f32 4352  ;;  %vm354_vm4 = vmand %vm352_vm0, %vm353_vm1 }
  0x61   : > { %v328_v5 = vpack.c.bf16 %v326_v2, %v326_v2  ;;  %v329_v10 = vpack.c.bf16 %v327_v7, %v327_v7  ;;  %vm359_vm5 = vmand %vm357_vm2, %vm358_vm3  ;;  %s1483_s15 = smov 1   ;;  %s1484_s7 = smov 127   ;;  %v1485_v23 = vmov 1983009808   ;;  %v394_v29 = vshrl.u32 %v393_v25, 7 }
  0x62   : > { %v331_v8 = vshrl.u32 %v324_v3, 16  ;;  %v334_v9 = vshll.u32 %v324_v3, 16  ;;  %v338_v11 = vshrl.u32 %v325_v6, 16  ;;  %v341_v12 = vshll.u32 %v325_v6, 16  ;;  %s1488_s5 = smov 64   ;;  %s1489_s11 = smov 16  }
  0x63   : > { %v348_v14 = vrot.slane %v328_v5, 4  ;;  %v349_v18 = vrot.slane %v329_v10, 4  ;;  %v391_v24 = vunpack.c.l.s4 %v1485_v23  ;;  %v1486_v30 = vmov 1934713408   ;;  %s1490_s12 = smov 80   ;;  %s1491_s4 = smov 32  }
  0x64   : > { %v333_v13 = vrot.slane %v331_v8, 7  ;;  %v340_v15 = vrot.slane %v338_v11, 7  ;;  %v407_v31 = vunpack.c.l.s4 %v1486_v30  ;;  %vm372_vm6 = vcmask 7168   ;;  %s1492_s29 = smov 96   ;;  %s1493_s9 = smov 48  }
  0x65   : > { %v392_v28 = vunpack.c.0.s8 %v391_v24  ;;  %vm381_vm7 = vcmask 121856   ;;  %vm1495_vm8 = vmmov 0   ;;  %s1496_s8 = smov 112   ;;  %vm493_vm9 = vcmask 130048   ;;  %p1135_p1 = scmp.ne.s32.totalorder %s1452_s21, 1 }
  0x66   : > { %v336_v16 = vor.u32 %v334_v9, %v333_v13  ;;  %v343_v17 = vor.u32 %v341_v12, %v340_v15  ;;  %v408_v37 = vunpack.c.0.s8 %v407_v31  ;;  %vm497_vm10 = vcmask 261120  }
  0x67   : > { %v1725_v36 = vsub.s32 %v392_v28, %v394_v29  ;;  %vm500_vm11 = vcmask 392192   ;;  %vm503_vm12 = vcmask 523264   ;;  %vm506_vm13 = vcmask 654336  }
  0x68   : > { %v355_v19 = vsel %vm354_vm4, %v328_v5, %v336_v16  ;;  %v356_v21 = vsel %vm354_vm4, %v329_v10, %v343_v17  ;;  %v1728_v45 = vsub.s32 %v408_v37, %v394_v29  ;;  %vm509_vm14 = vcmask 785408  }
  0x69   : > { %v360_v20 = vsel %vm359_vm5, %v355_v19, %v348_v14  ;;  %v361_v22 = vsel %vm359_vm5, %v356_v21, %v349_v18  ;;  %vm512_vm15 = vcmask 916480   ;;  %vm682_vm0 = vcmask 1042432  }
  0x6a   : > { %368 = vrot.lane.b32.xlu1 %v360_v20, %s1483_s15  ;;  %364 = vrot.lane.b32.xlu0 %v360_v20, %s1484_s7  ;;  %v530_v26 = vshll.u32 %v360_v20, 16  ;;  %v537_v27 = vshll.u32 %v361_v22, 16  ;;  %v528_v32 = vshrl.u32 %v360_v20, 16  ;;  %v535_v34 = vshrl.u32 %v361_v22, 16 }
  0x6b   : > { %v776_v38 = vrot.slane %v360_v20, 1  ;;  %v777_v39 = vrot.slane %v361_v22, 1  ;;  %v403_v44 = vrot.slane %v360_v20, %v1725_v36  ;;  %v436_v49 = vrot.slane %v361_v22, %v1725_v36 }
  0x6c   : > { %v532_v33 = vrot.slane %v530_v26, 1  ;;  %v539_v35 = vrot.slane %v537_v27, 1  ;;  %vm678_vm1 = vcmask 48128  }
  0x6d   : > { %v1733_v48 = vrot.slane %v776_v38, %v1725_v36  ;;  %v1737_v52 = vrot.slane %v777_v39, %v1725_v36 }
  0x6e   : > { %370 = vrot.lane.b32.xlu1 %v361_v22, %s1483_s15  ;;  %366 = vrot.lane.b32.xlu0 %v361_v22, %s1484_s7  ;;  %v533_v40 = vor.u32 %v532_v33, %v528_v32  ;;  %v540_v41 = vor.u32 %v539_v35, %v535_v34  ;;  %v1487_v34 = vmov 0  }
  0x70   : > { %v1740_v53 = vrot.slane %v533_v40, %v1725_v36  ;;  %v1743_v57 = vrot.slane %v540_v41, %v1725_v36 }
  0xdc   : > { %v369_v42 = vpop.permute.xlu1 %368  ;;  %v365_v43 = vpop.permute.xlu0 %364 }
  0xdd   : > { %v375_v46 = vsel %vm372_vm6, %v365_v43, %v369_v42  ;;  %v382_v47 = vsel %vm381_vm7, %v365_v43, %v369_v42 }
  0xde   : > { %v389_v50 = vcombine.low %v375_v46, %v382_v47  ;;  %v517_v51 = vshll.u32 %v375_v46, 16  ;;  %v543_v54 = vshll.u32 %v382_v47, 16  ;;  %v774_v55 = vrot.slane %v375_v46, 1 }
  0xdf   : > { %v778_v56 = vrot.slane %v382_v47, 1  ;;  %v515_v59 = vshrl.u32 %v375_v46, 16  ;;  %v541_v61 = vshrl.u32 %v382_v47, 16 }
  0xe0   : > { %v396_v58 = vrot.slane %v389_v50, %v1725_v36  ;;  %v519_v60 = vrot.slane %v517_v51, 1  ;;  %v371_v62 = vpop.permute.xlu1 %370  ;;  %v367_v63 = vpop.permute.xlu0 %366  ;;  %v545_v0 = vrot.slane %v543_v54, 1 }
  0xe1   : > { %v784_v1 = vcombine.low %v774_v55, %v778_v56  ;;  %v379_v2 = vsel %vm372_vm6, %v367_v63, %v371_v62  ;;  %v384_v3 = vsel %vm381_vm7, %v367_v63, %v371_v62 }
  0xe2   : > { %v404_v4 = vcombine.low %v396_v58, %v403_v44  ;;  %v405_v5 = vcombine.high %v396_v58, %v403_v44  ;;  %v520_v6 = vor.u32 %v519_v60, %v515_v59  ;;  %v422_v7 = vcombine.low %v379_v2, %v384_v3 }
  0xe3   : > { %v546_v8 = vor.u32 %v545_v0, %v541_v61  ;;  %v1749_v9 = vrot.slane %v784_v1, %v1725_v36  ;;  %v521_v10 = vshrl.u32 %v379_v2, 16  ;;  %v523_v11 = vshll.u32 %v379_v2, 16 }
  0xe4   : > { %v429_v12 = vrot.slane %v422_v7, %v1725_v36  ;;  %v547_v13 = vshrl.u32 %v384_v3, 16  ;;  %v549_v14 = vshll.u32 %v384_v3, 16  ;;  %v775_v15 = vrot.slane %v379_v2, 1 }
  0xe5   : > { %v557_v16 = vcombine.low %v520_v6, %v546_v8  ;;  %v800_v17 = vcombine.low %v1749_v9, %v1733_v48  ;;  %v525_v18 = vrot.slane %v523_v11, 1  ;;  %v779_v19 = vrot.slane %v384_v3, 1 }
  0xe6   : > { %v437_v20 = vcombine.low %v429_v12, %v436_v49  ;;  %v438_v21 = vcombine.high %v429_v12, %v436_v49  ;;  %v551_v22 = vrot.slane %v549_v14, 1  ;;  %v419_v23 = vrot.slane %v405_v5, %v1728_v45 }
  0xe7   : > { %v564_v24 = vrot.slane %v557_v16, %v1725_v36  ;;  %v526_v25 = vor.u32 %v525_v18, %v521_v10  ;;  %v818_v26 = vcombine.low %v775_v15, %v779_v19  ;;  %v1757_v27 = vrot.slane %v404_v4, %v1728_v45 }
  0xe8   : > { %v552_v28 = vor.u32 %v551_v22, %v547_v13  ;;  %v452_v29 = vrot.slane %v438_v21, %v1728_v45  ;;  %v1761_v30 = vrot.slane %v437_v20, %v1728_v45  ;;  %v470_v31 = vshrl.u32 %v419_v23, 16 }
  0xe9   : > { %v1764_v32 = vrot.slane %v818_v26, %v1725_v36  ;;  %v458_v33 = vshrl.u32 %v1757_v27, 16  ;;  %v420_v35 = vcombine.high %v1757_v27, %v1487_v34  ;;  %v1770_v37 = vcombine.high %v419_v23, %v1487_v34 }
  0xea   : > { %v591_v38 = vcombine.low %v526_v25, %v552_v28  ;;  %v469_v39 = vpack.i.b16 %v452_v29, %v419_v23  ;;  %v459_v40 = vshrl.u32 %v1761_v30, 16  ;;  %v471_v41 = vshrl.u32 %v452_v29, 16 }
  0xeb   : > { %v834_v42 = vcombine.low %v1764_v32, %v1737_v52  ;;  %v453_v43 = vcombine.high %v1761_v30, %v1487_v34  ;;  %v1778_v44 = vcombine.high %v452_v29, %v1487_v34  ;;  %v1781_v46 = vrot.slane %v800_v17, %v1728_v45 }
  0xec   : > { %v598_v47 = vrot.slane %v591_v38, %v1725_v36  ;;  %485 = vrot.lane.b32.xlu1 %v469_v39, %s1488_s5  ;;  %v460_v49 = vpack.i.b16 %v459_v40, %v458_v33  ;;  %v472_v50 = vpack.i.b16 %v471_v41, %v470_v31  ;;  %v464_v51 = vshrl.u32 %v420_v35, 16 }
  0xed   : > { %v463_v54 = vpack.i.b16 %v453_v43, %v420_v35  ;;  %v475_v55 = vpack.i.b16 %v1778_v44, %v1770_v37  ;;  %v1788_v56 = vrot.slane %v834_v42, %v1728_v45  ;;  %v855_v58 = vshrl.u32 %v1781_v46, 16 }
  0xee   : > { %479 = vrot.lane.b32.xlu0 %v460_v49, %s1489_s11  ;;  %v465_v59 = vshrl.u32 %v453_v43, 16  ;;  %v816_v36 = vcombine.high %v1781_v46, %v1487_v34  ;;  %v574_v60 = vcombine.high %v564_v24, %v1740_v53  ;;  %v608_v61 = vcombine.high %v598_v47, %v1743_v57 }
  0xef   : > { %v856_v62 = vshrl.u32 %v1788_v56, 16  ;;  %v850_v63 = vcombine.high %v1788_v56, %v1487_v34  ;;  %v573_v0 = vcombine.low %v564_v24, %v1740_v53  ;;  %v607_v1 = vcombine.low %v598_v47, %v1743_v57 }
  0xf0   : > { %487 = vrot.lane.b32.xlu1 %v472_v50, %s1490_s12  ;;  %v466_v2 = vpack.i.b16 %v465_v59, %v464_v51  ;;  %v588_v3 = vrot.slane %v574_v60, %v1728_v45  ;;  %v622_v4 = vrot.slane %v608_v61, %v1728_v45  ;;  %v861_v5 = vshrl.u32 %v816_v36, 16 }
  0xf1   : > { %v857_v6 = vpack.i.b16 %v856_v62, %v855_v58  ;;  %v860_v7 = vpack.i.b16 %v850_v63, %v816_v36  ;;  %v862_v8 = vshrl.u32 %v850_v63, 16  ;;  %v1805_v10 = vrot.slane %v573_v0, %v1728_v45 }
  0xf2   : > { %481 = vrot.lane.b32.xlu0 %v463_v54, %s1491_s4  ;;  %v639_v53 = vpack.i.b16 %v622_v4, %v588_v3  ;;  %v1809_v57 = vrot.slane %v607_v1, %v1728_v45  ;;  %v590_v11 = vcombine.high %v588_v3, %v1487_v34  ;;  %v624_v12 = vcombine.high %v622_v4, %v1487_v34 }
  0xf3   : > { %v863_v13 = vpack.i.b16 %v862_v8, %v861_v5  ;;  %v589_v14 = vcombine.high %v1805_v10, %v1487_v34  ;;  %v628_v15 = vshrl.u32 %v1805_v10, 16  ;;  %v640_v16 = vshrl.u32 %v588_v3, 16 }
  0xf4   : > { %489 = vrot.lane.b32.xlu1 %v475_v55, %s1492_s29  ;;  %v623_v17 = vcombine.high %v1809_v57, %v1487_v34  ;;  %v629_v18 = vshrl.u32 %v1809_v57, 16  ;;  %v645_v19 = vpack.i.b16 %v624_v12, %v590_v11  ;;  %v641_v20 = vshrl.u32 %v622_v4, 16 }
  0xf5   : > { %v646_v21 = vshrl.u32 %v590_v11, 16  ;;  %v647_v22 = vshrl.u32 %v624_v12, 16  ;;  %v634_v23 = vshrl.u32 %v589_v14, 16  ;;  %v476_v24 = vshrl.u32 %v1770_v37, 16 }
  0xf6   : > { %876 = vrot.lane.b32.xlu0 %v857_v6, %s1489_s11  ;;  %v633_v25 = vpack.i.b16 %v623_v17, %v589_v14  ;;  %v630_v26 = vpack.i.b16 %v629_v18, %v628_v15  ;;  %v642_v28 = vpack.i.b16 %v641_v20, %v640_v16  ;;  %v635_v29 = vshrl.u32 %v623_v17, 16 }
  0xf7   : > { %v648_v31 = vpack.i.b16 %v647_v22, %v646_v21  ;;  %v477_v33 = vshrl.u32 %v1778_v44, 16  ;;  %v801_v35 = vcombine.high %v1749_v9, %v1733_v48  ;;  %v835_v38 = vcombine.high %v1764_v32, %v1737_v52 }
  0xf8   : > { %483 = vrot.lane.b32.xlu1 %v466_v2, %s1493_s9  ;;  %v636_v39 = vpack.i.b16 %v635_v29, %v634_v23  ;;  %v457_v37 = vpack.i.b16 %v1761_v30, %v1757_v27  ;;  %v854_v40 = vpack.i.b16 %v1788_v56, %v1781_v46  ;;  %v627_v48 = vpack.i.b16 %v1809_v57, %v1805_v10  ;;  %v386_v23 = vld [vmem:[%s1719_s28] sm:$0xf] }
  0xf9   : > { %v478_v41 = vpack.i.b16 %v477_v33, %v476_v24  ;;  %v815_v42 = vrot.slane %v801_v35, %v1728_v45  ;;  %v849_v43 = vrot.slane %v835_v38, %v1728_v45  ;;  %v1494_v51 = vmov 0.0  }
  0xfa   : > { %878 = vrot.lane.b32.xlu0 %v860_v7, %s1491_s4  ;;  %1155 = vmatprep.subr.bf16.mxu1 %v1494_v51 }
  0xfb   : > { %v866_v52 = vpack.i.b16 %v849_v43, %v815_v42  ;;  %v817_v9 = vcombine.high %v815_v42, %v1487_v34  ;;  %v851_v32 = vcombine.high %v849_v43, %v1487_v34  ;;  %v867_v27 = vshrl.u32 %v815_v42, 16  ;;  %1149 = vmatprep.subr.bf16.mxu0 %v1494_v51  ;;  %1151 = vmatprep.mubr.msk.bf16.mxu0 %vm1495_vm8, %v1494_v51 }
  0xfc   : > { %655 = vrot.lane.b32.xlu1 %v639_v53, %s1488_s5  ;;  %v868_v30 = vshrl.u32 %v849_v43, 16  ;;  %1157 = vmatprep.mubr.msk.bf16.mxu1 %vm1495_vm8, %v1494_v51 }
  0xfd   : > { %v872_v44 = vpack.i.b16 %v851_v32, %v817_v9  ;;  %v873_v47 = vshrl.u32 %v817_v9, 16  ;;  %v874_v49 = vshrl.u32 %v851_v32, 16 }
  0xfe   : > { %880 = vrot.lane.b32.xlu0 %v863_v13, %s1493_s9  ;;  %v869_v45 = vpack.i.b16 %v868_v30, %v867_v27 }
  0xff   : > { %v875_v50 = vpack.i.b16 %v874_v49, %v873_v47 }
 0x100   : > { %651 = vrot.lane.b32.xlu1 %v633_v25, %s1491_s4 }
 0x102   : > { %649 = vrot.lane.b32.xlu0 %v630_v26, %s1489_s11 }
 0x104   : > { %659 = vrot.lane.b32.xlu1 %v645_v19, %s1492_s29 }
 0x106   : > { %657 = vrot.lane.b32.xlu0 %v642_v28, %s1490_s12  ;;  %v387_v28 = vld [vmem:[%s1719_s28 + $0x4] sm:$0xf] }
 0x108   : > { %661 = vrot.lane.b32.xlu1 %v648_v31, %s1496_s8 }
 0x10a   : > { %653 = vrot.lane.b32.xlu0 %v636_v39, %s1493_s9 }
 0x10c   : > { %491 = vrot.lane.b32.xlu1 %v478_v41, %s1496_s8 }
 0x10e   : > { %882 = vrot.lane.b32.xlu0 %v866_v52, %s1488_s5 }
 0x110   : > { %886 = vrot.lane.b32.xlu1 %v872_v44, %s1492_s29  ;;  %v951_v44 = vld [vmem:[%s1721_s24] sm:$0xff] }
 0x112   : > { %884 = vrot.lane.b32.xlu0 %v869_v45, %s1490_s12 }
 0x116   : > { %888 = vrot.lane.b32.xlu0 %v875_v50, %s1496_s8 }
 0x15e   : > { %v486_v34 = vpop.permute.xlu1 %485 }
 0x160   : > { %v480_v54 = vpop.permute.xlu0 %479 }
 0x161   : > { %v496_v1 = vsel %vm493_vm9, %v457_v37, %v480_v54  ;;  %v388_v37 = vld [vmem:[%s1719_s28 + $0x8] sm:$0xf]  ;;  %v1497_v54 = vmov (!%p1135_p1), 0  }
 0x162   : > { %v488_v55 = vpop.permute.xlu1 %487  ;;  %1305 = vset.pattern.permute.xlu0 (!%p1135_p1), %v1497_v54 }
 0x164   : > { %v482_v58 = vpop.permute.xlu0 %481 }
 0x165   : > { %v499_v2 = vsel %vm497_vm10, %v496_v1, %v482_v58 }
 0x166   : > { %v490_v59 = vpop.permute.xlu1 %489 }
 0x168   : > { %v877_v36 = vpop.permute.xlu0 %876 }
 0x169   : > { %v892_v21 = vsel %vm493_vm9, %v854_v40, %v877_v36 }
 0x16a   : > { %v484_v60 = vpop.permute.xlu1 %483 }
 0x16b   : > { %v502_v4 = vsel %vm500_vm11, %v499_v2, %v484_v60 }
 0x16c   : > { %v879_v61 = vpop.permute.xlu0 %878  ;;  %v505_v6 = vsel %vm503_vm12, %v502_v4, %v486_v34  ;;  %v959_v34 = vld [vmem:[%s1977_s3] sm:$0xff] (!%p1135_p1) }
 0x16d   : > { %v508_v53 = vsel %vm506_vm13, %v505_v6, %v488_v55  ;;  %v894_v24 = vsel %vm497_vm10, %v892_v21, %v879_v61  ;;  %962 = vperm.xlu0 (!%p1135_p1), %1305, %v959_v34  }
 0x16e   : > { %v656_v62 = vpop.permute.xlu1 %655  ;;  %v511_v15 = vsel %vm509_vm14, %v508_v53, %v490_v59 }
 0x170   : > { %v881_v63 = vpop.permute.xlu0 %880 }
 0x171   : > { %v896_v26 = vsel %vm500_vm11, %v894_v24, %v881_v63 }
 0x172   : > { %v652_v0 = vpop.permute.xlu1 %651 }
 0x174   : > { %v650_v3 = vpop.permute.xlu0 %649 }
 0x175   : > { %v665_v8 = vsel %vm493_vm9, %v627_v48, %v650_v3 }
 0x176   : > { %v660_v5 = vpop.permute.xlu1 %659  ;;  %v667_v57 = vsel %vm497_vm10, %v665_v8, %v652_v0 }
 0x178   : > { %v658_v7 = vpop.permute.xlu0 %657 }
 0x17a   : > { %v662_v10 = vpop.permute.xlu1 %661 }
 0x17c   : > { %v654_v11 = vpop.permute.xlu0 %653 }
 0x17d   : > { %v669_v12 = vsel %vm500_vm11, %v667_v57, %v654_v11 }
 0x17e   : > { %v671_v13 = vsel %vm503_vm12, %v669_v12, %v656_v62  ;;  %v492_v14 = vpop.permute.xlu1 %491 }
 0x17f   : > { %v514_v16 = vsel %vm512_vm15, %v511_v15, %v492_v14  ;;  %v673_v17 = vsel %vm506_vm13, %v671_v13, %v658_v7 }
 0x180   : > { %v883_v18 = vpop.permute.xlu0 %882  ;;  %v728_v19 = vsel %vm682_vm0, %v514_v16, 0  ;;  %v675_v20 = vsel %vm509_vm14, %v673_v17, %v660_v5 }
 0x181   : > { %1156 = vmatpush3.bf16.msra.mxu1 %v728_v19  ;;  %v677_v22 = vsel %vm512_vm15, %v675_v20, %v662_v10  ;;  %v898_v29 = vsel %vm503_vm12, %v896_v26, %v883_v18 }
 0x182   : > { %v683_v25 = vsel %vm682_vm0, %v677_v22, 0  ;;  %v887_v56 = vpop.permute.xlu1 %886 }
 0x183   : > { %1150 = vmatpush3.bf16.msra.mxu0 %v683_v25 }
 0x184   : > { %v885_v31 = vpop.permute.xlu0 %884  ;;  %1161 = vmatprep.subr.bf16.mxu0 %v1494_v51  ;;  %1158 = vmatmul.mubr.msk.bf16.vlgmr.msra.gmra.mrb[0].mxu1 %vm678_vm1, %v386_v23 }
 0x185   : > { %v900_v46 = vsel %vm506_vm13, %v898_v29, %v885_v31 }
 0x186   : > { %1152 = vmatmul.mubr.msk.bf16.vlgmr.msra.gmra.mrb[0].mxu0 %vm678_vm1, %v387_v28  ;;  %v902_v33 = vsel %vm509_vm14, %v900_v46, %v887_v56 }
 0x187   : > { %1163 = vmatprep.mubr.msk.bf16.mxu0 %vm1495_vm8, %v1494_v51 }
 0x188   : > { %v889_v35 = vpop.permute.xlu0 %888 }
 0x189   : > { %v904_v38 = vsel %vm512_vm15, %v902_v33, %v889_v35 }
 0x18a   : > { %v908_v39 = vsel %vm682_vm0, %v904_v38, 0 }
 0x18b   : > { %1162 = vmatpush3.bf16.msra.mxu0 %v908_v39 }
 0x18e   : > { %1164 = vmatmul.mubr.msk.bf16.vlgmr.msra.gmra.mrb[4].mxu0 %vm678_vm1, %v388_v37 }
 0x1ec   : > { %v963_v58 = vpop.permute.xlu0 (!%p1135_p1), %962 }
 0x257   : > { %v764_v40 = vpop.f32.mrb[0].mxu1 }
 0x258   : > { %v1159_v41 = vpop.f32.mrb[1].mxu1 }
 0x259   : > { %v719_v42 = vpop.f32.mrb[0].mxu0  ;;  %v767_v43 = vpop.f32.mrb[2].mxu1 }
 0x25a   : > { %v1153_v48 = vpop.f32.mrb[1].mxu0  ;;  %v765_v52 = vadd.f32 %v764_v40, %v719_v42  ;;  %v1160_v9 = vpop.f32.mrb[3].mxu1 }
 0x25b   : > { %v722_v32 = vpop.f32.mrb[2].mxu0 }
 0x25c   : > { %v1154_v27 = vpop.f32.mrb[3].mxu0 }
 0x260   : > { %957 = sbr.rel (%p1135_p1) target bundleno = 643 (0x283), region = 48 }
 0x261   : > { %v944_v30 = vpop.f32.mrb[4].mxu0 }
 0x262   : > { %v950_v47 = vadd.f32 %v944_v30, %v765_v52  ;;  %v1165_v49 = vpop.f32.mrb[5].mxu0 }
 0x263   : > { %v947_v45 = vpop.f32.mrb[6].mxu0 }
 0x264   : > { %v952_v50 = vadd.f32 %v951_v44, %v950_v47  ;;  %v1166_v51 = vpop.f32.mrb[7].mxu0 }
 0x266   : > { %953 = vst [vmem:[%s1721_s24] sm:$0xff] %v952_v50 }
 0x26d   : > { %v958_v55 = vld [vmem:[%s1721_s24] sm:$0xff] }
 0x26e   : > { %v965_v59 = vadd.f32 %v963_v58, %v958_v55 }
 0x270   : > { %v967_v36 = vmin.f32 %v965_v59, 0.0  ;;  %vm966_vm2 = vcmp.gt.f32.partialorder %v965_v59, 0.0 }
 0x272   : > { %v968_v60 = vmul.f32 1.442695, %v967_v36 }
 0x274   : > { %1306 = vpow2.f32 %v968_v60 }
 0x27e   : > { %v1307_v61 = vpop.eup %1306 }
 0x27f   : > { %v1136_v62 = vadd.f32 -1.0, %v1307_v61 }
 0x281   : > { %v971_v63 = vsel %vm966_vm2, %v965_v59, %v1136_v62 }
 0x282   : > { %972 = vst [vmem:[%s1721_s24] sm:$0xff] %v971_v63 }
 0x283 PF: > { %s2005_s21 = sld [smem:[#allocation13_spill]]  ;;  %s1139_s10 = sshll.u32 %s1706_s6, 7 }
 0x284   : > { %s2006_s28 = sld [smem:[#allocation15_spill]]  ;;  %s989_s7 = sshll.u32 %s1721_s24, 4  ;;  %s990_s7 = int_to_ptr.vmem [resolvable:$true] %s989_s7 }
 0x285   : > { %s2007_s5 = sand.u32 1, %s1432_s16   ;;  %s1338_s12 = scalar_lea.vmem %s990_s7, 128 }
 0x286   : > { %s974_s11 = scalar_lea.sflag [#allocation4], %s2007_s5  ;;  %p1339_p3 = scmp.ne.s32.totalorder %s990_s7, %s1338_s12 }
 0x287   : > { %s1498_s4 = smov [#allocation5]  }
 0x288   : > { %s1342_s29 = sshll.u32 %s1498_s4, 4  ;;  %s1343_s29 = int_to_ptr.vmem [resolvable:$false] %s1342_s29 }
 0x289   : > { %p2008_p8 = scmp.ne.s32.totalorder %s2005_s21, 0  ;;  %s1344_s9 = scalar_lea.vmem %s1343_s29, 256 }
 0x28a   : > { %s1903_s15 = scalar_lea.hbm %s2006_s28, %s1139_s10  ;;  %p1345_p13 = scmp.lt.s32.totalorder %s990_s7, %s1343_s29 }
 0x28b   : > { %p1340_p9 = pnand %p1339_p3, %p2008_p8  ;;  %p1346_p0 = scmp.lt.s32.totalorder %s1344_s9, %s1338_s12 }
 0x28d   : > { %p1341_p12 = pneg %p1340_p9  ;;  %p1347_p6 = por %p1346_p0, %p1345_p13 }
 0x28f   : > { %p1348_p5 = pnand %p1347_p6, %p1341_p12 }
 0x291   : > { %1351 = shalt.err (!%p1348_p5)
}
 0x292   : > { %s1352_s24 = scalar_lea.hbm %s1903_s15, 128  ;;  %s1356_s14 = scalar_lea.hbm %s2006_s28, 512 }
 0x293   : > { %p1353_p10 = scmp.ne.s32.totalorder %s1903_s15, %s1352_s24  ;;  %p1357_p7 = scmp.lt.u32.totalorder %s1903_s15, %s2006_s28 }
 0x294   : > { %p1358_p4 = scmp.lt.u32.totalorder %s1356_s14, %s1352_s24  ;;  %p1360_p3 = scmp.lt.u32.totalorder %s1352_s24, %s1903_s15 }
 0x295   : > { %p1354_p11 = pnand %p1353_p10, %p2008_p8 }
 0x296   : > { %p1359_p1 = por %p1358_p4, %p1357_p7 }
 0x297   : > { %p1355_p2 = pneg %p1354_p11 }
 0x298   : > { %p1361_p9 = por %p1360_p3, %p1359_p1 }
 0x29a   : > { %p1362_p12 = pnand %p1361_p9, %p1355_p2 }
 0x29c   : > { %1365 = shalt.err (!%p1362_p12)
}
 0x29d   : > { %1170 = dma.vmem_to_hbm [thread:$0]  (%p2008_p8), %s990_s7, 128, %s1903_s15, %s974_s11  }
 0x29e PF: > { %s2009_s18 = sld [smem:[#allocation8_spill]]  ;;  %s2010_s22 = sld [smem:[#allocation14_spill]] }
 0x29f   : > { %p1181_p13 = scmp.ge.s32.totalorder %s1476_s27, 2 }
 0x2a4   : > { %s1001_s5 = sand.u32 1, %s2009_s18   ;;  %p2011_p0 = scmp.ne.s32.totalorder %s2010_s22, 0 }
 0x2a5   : > { %s1002_s12 = scalar_lea.sflag [#allocation4], %s1001_s5 }
 0x2a6   : > { %p1177_p6 = pnand %p1181_p13, %p2011_p0 }
 0x2a8   : > { %1423 = dma.done.wait (!%p1177_p6), %s1002_s12, 128  }
 0x2a9   : > { %1425 = vsyncadd (!%p1177_p6), %s1002_s12, 4294967168  ;;  %s20_s27 = sadd.s32 1, %s1476_s27   ;;  %s2013_s21 = sld [smem:[#allocation9_spill]] }
 0x2aa   : > { %p1930_p5 = scmp.ge.s32.totalorder %s20_s27, 10   ;;  %s2014_s24 = sld [smem:[#allocation10_spill]] }
 0x2ab   : > { %s2015_s7 = sld [smem:[#allocation11_spill]]  ;;  %s2016_s11 = sld [smem:[#allocation12_spill]] }
 0x2ac   : > { %s2017_s15 = smov %s1432_s16  ;;  %s2018_s16 = smov %s1436_s17 }
 0x2ad   : > { %s2019_s17 = smov %s1636_s30  ;;  %s2020_s18 = smov %s1444_s19 }
 0x2ae   : > { %s2021_s19 = smov %s1448_s20  ;;  %s2022_s20 = smov %s1641_s13 }
 0x2af   : > { %s2023_s22 = smov %s1468_s25  ;;  %s2024_s23 = smov %s1472_s26 }
 0x2b0   :  { %19 = sbr.rel (!%p1930_p5) target bundleno = 12 (0xc), region = 95 }
 0x2b1   : > { %s2025_s25 = smov %s2015_s7  ;;  %s2026_s26 = smov %s2016_s11 }
 0x2b7   :  { %1007 = vsyncpa [#allocation3], 1 }
 0x2b8   :  { %1009 = vsyncpa [#allocation3 + $0x1], 1 }
 0x2b9   :  { %1010 = vsyncpa [#allocation4], 1 }
 0x2ba   :  { %1012 = vsyncpa [#allocation4 + $0x1], 1 }

</bundles_post_ra>
